<compile_context>
chip_gen: v7x
topology: tpu7x:2x2x1
jax: 0.10.0
libtpu: 0.0.40
codegen_flags: <defaults>
</compile_context>

<pallas_src>
import random
from typing import NamedTuple

import jax
import jax.numpy as jnp
from jax.experimental import pallas as pl
from jax.experimental.pallas import tpu as pltpu


def _round_up(x: int, m: int) -> int:
    return ((x + m - 1) // m) * m


def _vmem_capacity_bytes() -> int:
    try:
        return int(pltpu.get_tpu_info().vmem_capacity_bytes)
    except Exception:
        return 64 << 20  # conservative (v7x per-core VMEM)


class SlabGeom(NamedTuple):
    rows: int        # true rows
    cols: int        # true cols
    tile_rows: int   # rows per grid step (multiple of 8)
    row_tiles: int   # grid steps along rows
    slab_rows: int   # tile_rows * row_tiles (zero-padded)
    slab_cols: int   # round_up(cols, 128)   (zero-padded)


def make_slab_geometry(enc_shape, dec_shape, itemsize: int = 4):
    """Shared tiling geometry for the enc / dec hypernet-weight groups.

    Both groups are streamed by one kernel, so the double-buffered input-tile
    footprint is 2 groups x 2 inputs x 2 buffers = 4 * tile_rows * (ce + cd)
    bytes; tile_rows is sized against the generation's VMEM capacity."""
    er, ec = enc_shape
    dr, dc = dec_shape
    ce, cd = _round_up(ec, 128), _round_up(dc, 128)
    er8, dr8 = _round_up(er, 8), _round_up(dr, 8)

    vmem_cap = _vmem_capacity_bytes()
    tile_budget = min(vmem_cap // 2, 48 << 20)        # v6e/v5e: 48 MiB, v7x: 32 MiB
    cap_rows = max(8, (tile_budget // (4 * (ce + cd) * itemsize)) // 8 * 8)

    te, td = min(cap_rows, er8), min(cap_rows, dr8)
    nte, ntd = -(-er8 // te), -(-dr8 // td)

    geom_enc = SlabGeom(er, ec, te, nte, nte * te, ce)
    geom_dec = SlabGeom(dr, dc, td, ntd, ntd * td, cd)
    vmem_limit = min((vmem_cap * 3) // 4, 96 << 20)
    return geom_enc, geom_dec, vmem_limit


def pad_to_slab(x: jax.Array, g: SlabGeom) -> jax.Array:
    """Zero-pad a (rows, cols) tensor to its slab shape (keeps source dtype)."""
    r, c = x.shape
    return jnp.pad(x, ((0, g.slab_rows - r), (0, g.slab_cols - c)))


def _safe_sqrt(x: jax.Array) -> jax.Array:
    # Exact value, but zero (not NaN) gradient at x == 0 under jax.grad.
    pos = x > 0
    return jnp.where(pos, jnp.sqrt(jnp.where(pos, x, 1.0)), 0.0)


# ----------------------------------------------------------------------------
# Pallas kernel: per-sample sum((pred - gt)**2) for BOTH weight groups in one
# call.  grid = (n_sampled [parallel], row_tiles [arbitrary / reduction]).
# GT records are gathered in-kernel via the scalar-prefetched index array.
# ----------------------------------------------------------------------------
def paired_hyper_sse(idx, pred_enc, gt_enc, pred_dec, gt_dec,
                     geom_enc: SlabGeom, geom_dec: SlabGeom,
                     *, vmem_limit_bytes: int):
    n = pred_enc.shape[0]
    te, ce, nte = geom_enc.tile_rows, geom_enc.slab_cols, geom_enc.row_tiles
    td, cd, ntd = geom_dec.tile_rows, geom_dec.slab_cols, geom_dec.row_tiles
    grid_rows = max(nte, ntd)

    def _partial_reduce(sq, tile_rows, cols):
        # (tile_rows, cols) -> (8, cols): sublane-blocked partial sum,
        # pure vreg-to-vreg VPU adds (no XLU), tiny accumulator store.
        if tile_rows == 8:
            return sq
        return jnp.sum(sq.reshape(tile_rows // 8, 8, cols), axis=0)

    def kernel(idx_ref, pe_ref, ge_ref, pd_ref, gd_ref,
               oe_ref, od_ref, acc_e, acc_d):
        del idx_ref  # only used by the index maps
        r = pl.program_id(1)

        @pl.when(r == 0)
        def _():
            acc_e[...] = jnp.zeros_like(acc_e)
            acc_d[...] = jnp.zeros_like(acc_d)

        def do_enc():
            d = pe_ref[0].astype(jnp.float32) - ge_ref[0].astype(jnp.float32)
            acc_e[...] += _partial_reduce(d * d, te, ce)

        def do_dec():
            d = pd_ref[0].astype(jnp.float32) - gd_ref[0].astype(jnp.float32)
            acc_d[...] += _partial_reduce(d * d, td, cd)

        # Groups can have different row-tile counts; gate the shorter one
        # (its clamped index_map re-visits the same block -> no extra DMA).
        if nte == grid_rows:
            do_enc()
        else:
            pl.when(r < nte)(do_enc)
        if ntd == grid_rows:
            do_dec()
        else:
            pl.when(r < ntd)(do_dec)

        @pl.when(r == grid_rows - 1)
        def _():
            # One cross-lane/sublane reduce per sample, lane-dense store.
            oe_ref[...] = jnp.broadcast_to(jnp.sum(acc_e[...]), oe_ref.shape)
            od_ref[...] = jnp.broadcast_to(jnp.sum(acc_d[...]), od_ref.shape)

    # Preds are already ordered by sample (index t); GT slabs hold ALL records
    # and are gathered by the prefetched sample index (no host-side gather).
    pe_map = lambda t, r, idx_ref: (t, jnp.minimum(r, nte - 1), 0)
    ge_map = lambda t, r, idx_ref: (idx_ref[t], jnp.minimum(r, nte - 1), 0)
    pd_map = lambda t, r, idx_ref: (t, jnp.minimum(r, ntd - 1), 0)
    gd_map = lambda t, r, idx_ref: (idx_ref[t], jnp.minimum(r, ntd - 1), 0)
    out_map = lambda t, r, idx_ref: (t, 0, 0)

    grid_spec = pltpu.PrefetchScalarGridSpec(
        num_scalar_prefetch=1,
        grid=(n, grid_rows),
        in_specs=[
            pl.BlockSpec((1, te, ce), pe_map),
            pl.BlockSpec((1, te, ce), ge_map),
            pl.BlockSpec((1, td, cd), pd_map),
            pl.BlockSpec((1, td, cd), gd_map),
        ],
        out_specs=[
            pl.BlockSpec((1, 8, 128), out_map),
            pl.BlockSpec((1, 8, 128), out_map),
        ],
        scratch_shapes=[
            pltpu.VMEM((8, ce), jnp.float32),
            pltpu.VMEM((8, cd), jnp.float32),
        ],
    )

    out_enc, out_dec = pl.pallas_call(
        kernel,
        out_shape=(jax.ShapeDtypeStruct((n, 8, 128), jnp.float32),
                   jax.ShapeDtypeStruct((n, 8, 128), jnp.float32)),
        grid_spec=grid_spec,
        compiler_params=pltpu.CompilerParams(
            # TODO(synk): on v7x with n_sampled < 2, shard rows (not samples)
            # across the two TensorCores so neither core idles.
            dimension_semantics=("parallel", "arbitrary"),
            vmem_limit_bytes=vmem_limit_bytes,
        ),
    )(idx, pred_enc, gt_enc, pred_dec, gt_dec)
    return out_enc[:, 0, 0], out_dec[:, 0, 0]


# ----------------------------------------------------------------------------
# MemoryLoss equivalent (synthetic "preloaded" memory, deterministic records)
# ----------------------------------------------------------------------------
class MemoryLoss:
    """JAX/Pallas equivalent of the forgetting-prevention MemoryLoss.

    Synthetic records stand in for the z_*.pth files.  GT hypernet weights are
    zero-padded and stacked into per-group slabs ONCE here (they are static)."""

    def __init__(self, records):
        enc_shapes = {tuple(r["hyper_enc"].shape) for r in records}
        dec_shapes = {tuple(r["hyper_dec"].shape) for r in records}
        assert len(enc_shapes) == 1 and len(dec_shapes) == 1, \
            "all records must share per-group hypernet-weight shapes"
        # TODO(synk): ragged per-record shapes would need a flatten+concat slab
        # with scalar-prefetched offsets instead of per-group slabs.
        self.geom_enc, self.geom_dec, self.vmem_limit_bytes = make_slab_geometry(
            next(iter(enc_shapes)), next(iter(dec_shapes)))

        self.z_enc = jnp.stack([r["z_enc"] for r in records])
        self.z_dec = jnp.stack([r["z_dec"] for r in records])
        # Cached padded+stacked GT slabs (kept in their source dtype; the
        # kernel upcasts to f32 in-register, so bf16 records halve HBM bytes).
        self.gt_enc_slab = jnp.stack(
            [pad_to_slab(r["hyper_enc"], self.geom_enc) for r in records])
        self.gt_dec_slab = jnp.stack(
            [pad_to_slab(r["hyper_dec"], self.geom_dec) for r in records])
        self.n_records = len(records)
        self.last_indices = None

    def forward(self, model, mem_coeff):
        index_list = list(range(self.n_records))
        if len(index_list) > 10:
            sample_len = int(0.2 * len(index_list))
        else:
            sample_len = len(index_list)
        index_list = random.sample(index_list, sample_len)
        self.last_indices = index_list
        idx = jnp.asarray(index_list, dtype=jnp.int32)

        # Model emits preds directly in the padded slab layout (batched z @ W);
        # no per-record pad/stack pre-pass over pred bytes.
        # TODO(synk): fuse the z @ W matmul into the reduction kernel only when
        # 2 * n_sampled > z_dim and W tiles can be reused across samples;
        # otherwise fusion inflates HBM traffic.
        pred_enc, pred_dec = model.get_hypernet_weights_batched(
            self.z_enc[idx], self.z_dec[idx])

        sse_enc, sse_dec = paired_hyper_sse(
            idx, pred_enc, self.gt_enc_slab, pred_dec, self.gt_dec_slab,
            self.geom_enc, self.geom_dec,
            vmem_limit_bytes=self.vmem_limit_bytes)

        losses = mem_coeff * (_safe_sqrt(sse_enc) + _safe_sqrt(sse_dec)) / 2.0
        # TODO(synk): the PyTorch module calls loss.backward() and prints each
        # per-record loss here; gradients are left to jax.grad at the call site.
        return losses

    __call__ = forward


# ----------------------------------------------------------------------------
# Tiny deterministic stand-in for `model.get_hypernet_weights` (plain JAX glue)
# ----------------------------------------------------------------------------
class DummyHyperModel:
    def __init__(self, key, z_dim, geom_enc: SlabGeom, geom_dec: SlabGeom):
        k1, k2 = jax.random.split(key)
        self.geom_enc, self.geom_dec = geom_enc, geom_dec
        self.w_enc = jax.random.normal(
            k1, (z_dim, geom_enc.rows * geom_enc.cols), jnp.float32) * 0.05
        self.w_dec = jax.random.normal(
            k2, (z_dim, geom_dec.rows * geom_dec.cols), jnp.float32) * 0.05
        # Zero-padded copies (built once) so the batched matmul output is
        # already in the (n, slab_rows, slab_cols) layout the kernel consumes;
        # padded positions are exactly 0, matching the zero-padded GT slabs.
        self.w_enc_pad = self._pad_w(self.w_enc, geom_enc)
        self.w_dec_pad = self._pad_w(self.w_dec, geom_dec)

    @staticmethod
    def _pad_w(w, g: SlabGeom):
        z_dim = w.shape[0]
        w3 = w.reshape(z_dim, g.rows, g.cols)
        w3 = jnp.pad(w3, ((0, 0), (0, g.slab_rows - g.rows),
                          (0, g.slab_cols - g.cols)))
        return w3.reshape(z_dim, g.slab_rows * g.slab_cols)

    def get_hypernet_weights(self, z_enc, z_dec):
        # Per-record, unpadded (original interface; used for the reference).
        pe = (z_enc @ self.w_enc).reshape(self.geom_enc.rows, self.geom_enc.cols)
        pd = (z_dec @ self.w_dec).reshape(self.geom_dec.rows, self.geom_dec.cols)
        return pe, pd

    def get_hypernet_weights_batched(self, Z_enc, Z_dec):
        ge, gd = self.geom_enc, self.geom_dec
        pe = (Z_enc @ self.w_enc_pad).reshape(-1, ge.slab_rows, ge.slab_cols)
        pd = (Z_dec @ self.w_dec_pad).reshape(-1, gd.slab_rows, gd.slab_cols)
        return pe, pd


# ----------------------------------------------------------------------------
# main
# ----------------------------------------------------------------------------
if __name__ == "__main__":
    random.seed(0)
    key = jax.random.PRNGKey(0)

    Z_DIM = 32          # latent dim
    ENC_ROWS = 16       # hypernet-enc weight rows
    DEC_ROWS = 40       # hypernet-dec weight rows (different slab than enc)
    COLS = 200          # exercises lane padding to 256
    N_RECORDS = 3

    # Deterministic synthetic "preloaded" memory records.
    records = []
    for _ in range(N_RECORDS):
        key, k1, k2, k3, k4 = jax.random.split(key, 5)
        records.append({
            "z_enc": jax.random.normal(k1, (Z_DIM,), jnp.float32),
            "z_dec": jax.random.normal(k2, (Z_DIM,), jnp.float32),
            "hyper_enc": jax.random.normal(k3, (ENC_ROWS, COLS), jnp.float32),
            "hyper_dec": jax.random.normal(k4, (DEC_ROWS, COLS), jnp.float32),
        })

    mem_loss = MemoryLoss(records)
    key, mk = jax.random.split(key)
    model = DummyHyperModel(mk, Z_DIM, mem_loss.geom_enc, mem_loss.geom_dec)

    losses = mem_loss(model, mem_coeff=1.0)
    losses = jax.block_until_ready(losses)

    # Cross-check against a pure-JAX reference on the *unpadded* tensors,
    # using the actual sampled index order recorded by forward().
    ok = True
    for j, i in enumerate(mem_loss.last_indices):
        pe, pd = model.get_hypernet_weights(records[i]["z_enc"],
                                            records[i]["z_dec"])
        ref = (jnp.linalg.norm(pe - records[i]["hyper_enc"]) +
               jnp.linalg.norm(pd - records[i]["hyper_dec"])) / 2.0
        if not jnp.allclose(losses[j], ref, rtol=1e-4, atol=1e-4):
            ok = False

    if ok:
        print("KERNEL_OK")
</pallas_src>

<mosaic_0001>
module attributes {stable_mosaic.version = 11 : i64} {
  func.func @kernel(%arg0: i32, %arg1: i32, %arg2: memref<3xi32, #tpu.memory_space<smem>>, %arg3: memref<1x16x256xf32, #tpu.memory_space<vmem>>, %arg4: memref<1x16x256xf32, #tpu.memory_space<vmem>>, %arg5: memref<1x40x256xf32, #tpu.memory_space<vmem>>, %arg6: memref<1x40x256xf32, #tpu.memory_space<vmem>>, %arg7: memref<1x8x128xf32, #tpu.memory_space<vmem>>, %arg8: memref<1x8x128xf32, #tpu.memory_space<vmem>>, %arg9: memref<8x256xf32, #tpu.memory_space<vmem>>, %arg10: memref<8x256xf32, #tpu.memory_space<vmem>>) attributes {dimension_semantics = [#tpu.dimension_semantics<parallel>, #tpu.dimension_semantics<arbitrary>], iteration_bounds = array<i64: 3, 1>, scalar_prefetch = 1 : i64, scratch_operands = 2 : i64, tpu.core_type = #tpu.core_type<tc>, window_params = [{transform_indices = @transform_0, window_bounds = array<i64: 1, 16, 256>}, {transform_indices = @transform_1, window_bounds = array<i64: 1, 16, 256>}, {transform_indices = @transform_2, window_bounds = array<i64: 1, 40, 256>}, {transform_indices = @transform_3, window_bounds = array<i64: 1, 40, 256>}, {transform_indices = @transform_4, window_bounds = array<i64: 1, 8, 128>}, {transform_indices = @transform_5, window_bounds = array<i64: 1, 8, 128>}]} {
    %c0_i32 = arith.constant 0 : i32
    %0 = arith.cmpi eq, %arg1, %c0_i32 : i32
    %1 = arith.extui %0 : i1 to i32
    %c0_i32_0 = arith.constant 0 : i32
    %2 = arith.cmpi ne, %1, %c0_i32_0 : i32
    scf.if %2 {
      %cst_23 = arith.constant 0.000000e+00 : f32
      %28 = vector.broadcast %cst_23 : f32 to vector<8x256xf32>
      %c0_24 = arith.constant 0 : index
      %c0_25 = arith.constant 0 : index
      %29 = vector.load %arg9[%c0_24, %c0_25] : memref<8x256xf32, #tpu.memory_space<vmem>>, vector<8x256xf32>
      tpu.vector_store %arg9[%c0_24, %c0_25], %28 {strides = array<i32>} : memref<8x256xf32, #tpu.memory_space<vmem>>, vector<8x256xf32>,
      %cst_26 = arith.constant 0.000000e+00 : f32
      %30 = vector.broadcast %cst_26 : f32 to vector<8x256xf32>
      %c0_27 = arith.constant 0 : index
      %c0_28 = arith.constant 0 : index
      %31 = vector.load %arg10[%c0_27, %c0_28] : memref<8x256xf32, #tpu.memory_space<vmem>>, vector<8x256xf32>
      tpu.vector_store %arg10[%c0_27, %c0_28], %30 {strides = array<i32>} : memref<8x256xf32, #tpu.memory_space<vmem>>, vector<8x256xf32>,
    } else {
    }
    %c0 = arith.constant 0 : index
    %c0_1 = arith.constant 0 : index
    %c0_2 = arith.constant 0 : index
    %3 = vector.load %arg3[%c0, %c0_1, %c0_2] : memref<1x16x256xf32, #tpu.memory_space<vmem>>, vector<1x16x256xf32>
    %4 = vector.shape_cast %3 : vector<1x16x256xf32> to vector<16x256xf32>
    %c0_3 = arith.constant 0 : index
    %c0_4 = arith.constant 0 : index
    %c0_5 = arith.constant 0 : index
    %5 = vector.load %arg4[%c0_3, %c0_4, %c0_5] : memref<1x16x256xf32, #tpu.memory_space<vmem>>, vector<1x16x256xf32>
    %6 = vector.shape_cast %5 : vector<1x16x256xf32> to vector<16x256xf32>
    %7 = arith.subf %4, %6 : vector<16x256xf32>
    %c0_6 = arith.constant 0 : index
    %c0_7 = arith.constant 0 : index
    %8 = vector.load %arg9[%c0_6, %c0_7] : memref<8x256xf32, #tpu.memory_space<vmem>>, vector<8x256xf32>
    %9 = arith.mulf %7, %7 : vector<16x256xf32>
    %10 = vector.shape_cast %9 : vector<16x256xf32> to vector<2x8x256xf32>
    %cst = arith.constant dense<0.000000e+00> : vector<8x256xf32>
    %11 = vector.multi_reduction <add>, %10, %cst [0] : vector<2x8x256xf32> to vector<8x256xf32>
    %12 = arith.addf %8, %11 : vector<8x256xf32>
    %c0_8 = arith.constant 0 : index
    %c0_9 = arith.constant 0 : index
    %13 = vector.load %arg9[%c0_8, %c0_9] : memref<8x256xf32, #tpu.memory_space<vmem>>, vector<8x256xf32>
    tpu.vector_store %arg9[%c0_8, %c0_9], %12 {strides = array<i32>} : memref<8x256xf32, #tpu.memory_space<vmem>>, vector<8x256xf32>,
    %c0_10 = arith.constant 0 : index
    %c0_11 = arith.constant 0 : index
    %c0_12 = arith.constant 0 : index
    %14 = vector.load %arg5[%c0_10, %c0_11, %c0_12] : memref<1x40x256xf32, #tpu.memory_space<vmem>>, vector<1x40x256xf32>
    %15 = vector.shape_cast %14 : vector<1x40x256xf32> to vector<40x256xf32>
    %c0_13 = arith.constant 0 : index
    %c0_14 = arith.constant 0 : index
    %c0_15 = arith.constant 0 : index
    %16 = vector.load %arg6[%c0_13, %c0_14, %c0_15] : memref<1x40x256xf32, #tpu.memory_space<vmem>>, vector<1x40x256xf32>
    %17 = vector.shape_cast %16 : vector<1x40x256xf32> to vector<40x256xf32>
    %18 = arith.subf %15, %17 : vector<40x256xf32>
    %c0_16 = arith.constant 0 : index
    %c0_17 = arith.constant 0 : index
    %19 = vector.load %arg10[%c0_16, %c0_17] : memref<8x256xf32, #tpu.memory_space<vmem>>, vector<8x256xf32>
    %20 = arith.mulf %18, %18 : vector<40x256xf32>
    %21 = vector.shape_cast %20 : vector<40x256xf32> to vector<5x8x256xf32>
    %cst_18 = arith.constant dense<0.000000e+00> : vector<8x256xf32>
    %22 = vector.multi_reduction <add>, %21, %cst_18 [0] : vector<5x8x256xf32> to vector<8x256xf32>
    %23 = arith.addf %19, %22 : vector<8x256xf32>
    %c0_19 = arith.constant 0 : index
    %c0_20 = arith.constant 0 : index
    %24 = vector.load %arg10[%c0_19, %c0_20] : memref<8x256xf32, #tpu.memory_space<vmem>>, vector<8x256xf32>
    tpu.vector_store %arg10[%c0_19, %c0_20], %23 {strides = array<i32>} : memref<8x256xf32, #tpu.memory_space<vmem>>, vector<8x256xf32>,
    %c0_i32_21 = arith.constant 0 : i32
    %25 = arith.cmpi eq, %arg1, %c0_i32_21 : i32
    %26 = arith.extui %25 : i1 to i32
    %c0_i32_22 = arith.constant 0 : i32
    %27 = arith.cmpi ne, %26, %c0_i32_22 : i32
    scf.if %27 {
      %c0_23 = arith.constant 0 : index
      %c0_24 = arith.constant 0 : index
      %28 = vector.load %arg9[%c0_23, %c0_24] : memref<8x256xf32, #tpu.memory_space<vmem>>, vector<8x256xf32>
      %29 = vector.shape_cast %28 : vector<8x256xf32> to vector<1x8x256xf32>
      %cst_25 = arith.constant dense<0.000000e+00> : vector<1xf32>
      %30 = vector.multi_reduction <add>, %29, %cst_25 [1, 2] : vector<1x8x256xf32> to vector<1xf32>
      %31 = vector.shape_cast %30 : vector<1xf32> to vector<1x1x1xf32>
      %32 = vector.extract %31[0, 0, 0] : f32 from vector<1x1x1xf32>
      %33 = vector.broadcast %32 : f32 to vector<1x8x128xf32>
      %c0_26 = arith.constant 0 : index
      %c0_27 = arith.constant 0 : index
      %c0_28 = arith.constant 0 : index
      %34 = vector.load %arg7[%c0_26, %c0_27, %c0_28] : memref<1x8x128xf32, #tpu.memory_space<vmem>>, vector<1x8x128xf32>
      tpu.vector_store %arg7[%c0_26, %c0_27, %c0_28], %33 {strides = array<i32>} : memref<1x8x128xf32, #tpu.memory_space<vmem>>, vector<1x8x128xf32>,
      %c0_29 = arith.constant 0 : index
      %c0_30 = arith.constant 0 : index
      %35 = vector.load %arg10[%c0_29, %c0_30] : memref<8x256xf32, #tpu.memory_space<vmem>>, vector<8x256xf32>
      %36 = vector.shape_cast %35 : vector<8x256xf32> to vector<1x8x256xf32>
      %cst_31 = arith.constant dense<0.000000e+00> : vector<1xf32>
      %37 = vector.multi_reduction <add>, %36, %cst_31 [1, 2] : vector<1x8x256xf32> to vector<1xf32>
      %38 = vector.shape_cast %37 : vector<1xf32> to vector<1x1x1xf32>
      %39 = vector.extract %38[0, 0, 0] : f32 from vector<1x1x1xf32>
      %40 = vector.broadcast %39 : f32 to vector<1x8x128xf32>
      %c0_32 = arith.constant 0 : index
      %c0_33 = arith.constant 0 : index
      %c0_34 = arith.constant 0 : index
      %41 = vector.load %arg8[%c0_32, %c0_33, %c0_34] : memref<1x8x128xf32, #tpu.memory_space<vmem>>, vector<1x8x128xf32>
      tpu.vector_store %arg8[%c0_32, %c0_33, %c0_34], %40 {strides = array<i32>} : memref<1x8x128xf32, #tpu.memory_space<vmem>>, vector<1x8x128xf32>,
    } else {
    }
    return
  }
  func.func @transform_0(%arg0: i32, %arg1: i32, %arg2: memref<3xi32, #tpu.memory_space<smem>>) -> (i32, i32, i32) {
    %c0_i32 = arith.constant 0 : i32
    %0 = arith.minsi %arg1, %c0_i32 : i32
    %c0_i32_0 = arith.constant 0 : i32
    %c0_i32_1 = arith.constant 0 : i32
    return %arg0, %0, %c0_i32_0 : i32, i32, i32
  }
  func.func @transform_1(%arg0: i32, %arg1: i32, %arg2: memref<3xi32, #tpu.memory_space<smem>>) -> (i32, i32, i32) {
    %0 = arith.index_cast %arg0 : i32 to index
    %1 = memref.load %arg2[%0] : memref<3xi32, #tpu.memory_space<smem>>
    %c0_i32 = arith.constant 0 : i32
    %2 = arith.minsi %arg1, %c0_i32 : i32
    %c0_i32_0 = arith.constant 0 : i32
    %c0_i32_1 = arith.constant 0 : i32
    return %1, %2, %c0_i32_0 : i32, i32, i32
  }
  func.func @transform_2(%arg0: i32, %arg1: i32, %arg2: memref<3xi32, #tpu.memory_space<smem>>) -> (i32, i32, i32) {
    %c0_i32 = arith.constant 0 : i32
    %0 = arith.minsi %arg1, %c0_i32 : i32
    %c0_i32_0 = arith.constant 0 : i32
    %c0_i32_1 = arith.constant 0 : i32
    return %arg0, %0, %c0_i32_0 : i32, i32, i32
  }
  func.func @transform_3(%arg0: i32, %arg1: i32, %arg2: memref<3xi32, #tpu.memory_space<smem>>) -> (i32, i32, i32) {
    %0 = arith.index_cast %arg0 : i32 to index
    %1 = memref.load %arg2[%0] : memref<3xi32, #tpu.memory_space<smem>>
    %c0_i32 = arith.constant 0 : i32
    %2 = arith.minsi %arg1, %c0_i32 : i32
    %c0_i32_0 = arith.constant 0 : i32
    %c0_i32_1 = arith.constant 0 : i32
    return %1, %2, %c0_i32_0 : i32, i32, i32
  }
  func.func @transform_4(%arg0: i32, %arg1: i32, %arg2: memref<3xi32, #tpu.memory_space<smem>>) -> (i32, i32, i32) {
    %c0_i32 = arith.constant 0 : i32
    %c0_i32_0 = arith.constant 0 : i32
    %c0_i32_1 = arith.constant 0 : i32
    return %arg0, %c0_i32, %c0_i32_0 : i32, i32, i32
  }
  func.func @transform_5(%arg0: i32, %arg1: i32, %arg2: memref<3xi32, #tpu.memory_space<smem>>) -> (i32, i32, i32) {
    %c0_i32 = arith.constant 0 : i32
    %c0_i32_0 = arith.constant 0 : i32
    %c0_i32_1 = arith.constant 0 : i32
    return %arg0, %c0_i32, %c0_i32_0 : i32, i32, i32
  }
}

</mosaic_0001>

<bundles_post_ra>
// kernel: tpu_custom_call.1
= control target key start
LH: loop header
LB: loop body
LE: loop exit
PB: predicated region body
PF: predicated region fallthrough
CT: control target
= control target key end

     0   :  { %s1824_s0 = inlined_call_operand.hbm [shape: s32[3], index: 0, kind: input, shape index: {}]   ;;  %s1825_s1 = inlined_call_operand.hbm [shape: f32[3,16,256], index: 1, kind: input, shape index: {}]   ;;  %s1826_s2 = inlined_call_operand.hbm [shape: f32[3,16,256], index: 2, kind: input, shape index: {}]   ;;  %s1827_s3 = inlined_call_operand.hbm [shape: f32[3,40,256], index: 3, kind: input, shape index: {}]   ;;  %s1828_s4 = inlined_call_operand.hbm [shape: f32[3,40,256], index: 4, kind: input, shape index: {}]   ;;  %s1829_s5 = inlined_call_operand.hbm [shape: f32[3,8,128], index: 5, kind: output, shape index: {0}]   ;;  %s1830_s6 = inlined_call_operand.hbm [shape: f32[3,8,128], index: 6, kind: output, shape index: {1}]  }
   0x1   :  { %1850 = sst [smem:[#allocation35_spill]] %s1825_s1  ;;  %s965_s23 = scalar_lea.hbm %s1824_s0, 16 }
   0x2   :  { %1851 = sst [smem:[#allocation36_spill]] %s1826_s2  ;;  %p966_p0 = scmp.ne.s32.totalorder %s1824_s0, %s965_s23 }
   0x3   :  { %1852 = sst [smem:[#allocation37_spill]] %s1827_s3  ;;  %p969_p1 = scmp.lt.u32.totalorder %s965_s23, %s1824_s0 }
   0x4   :  { %1853 = sst [smem:[#allocation38_spill]] %s1829_s5 }
   0x5   :  { %1854 = sst [smem:[#allocation39_spill]] %s1830_s6  ;;  %p971_p2 = pnand %p969_p1, %p966_p0 }
   0x7   :  { %974 = shalt.err (!%p971_p2)  }
   0x8   :  { %s1273_s28 = smov [#allocation5]  }
   0x9   :  { %13 = dma.hbm_to_smem %s1824_s0, 16, %s1273_s28, [#allocation4] }
   0xa   :  { %1199 = dma.done.wait [#allocation4], 16 }
   0xb   :  { %1200 = vsyncadd [#allocation4], 4294967280 }
   0xc   :  { %15 = sfence }
   0xd   :  { %16 = vsyncpa [#allocation7], 0 }
   0xe   :  { %18 = vsyncpa [#allocation7 + $0x1], 0 }
   0xf   :  { %19 = vsyncpa [#allocation10], 0 }
  0x10   :  { %21 = vsyncpa [#allocation10 + $0x1], 0 }
  0x11   :  { %22 = vsyncpa [#allocation13], 0 }
  0x12   :  { %24 = vsyncpa [#allocation13 + $0x1], 0 }
  0x13   :  { %25 = vsyncpa [#allocation8], 0 }
  0x14   :  { %27 = vsyncpa [#allocation8 + $0x1], 0 }
  0x15   :  { %28 = vsyncpa [#allocation16], 0 }
  0x16   :  { %30 = vsyncpa [#allocation16 + $0x1], 0  ;;  %s1329_s7 = smov 0   ;;  %s1331_s8 = smov 0  }
  0x17   :  { %s1333_s9 = smov 0   ;;  %s1335_s0 = smov 0  }
  0x18   :  { %s1337_s10 = smov 0   ;;  %s1339_s11 = smov 0  }
  0x19   :  { %s1341_s12 = smov 0   ;;  %s1343_s13 = smov 0  }
  0x1a   :  { %s1345_s14 = smov 0   ;;  %s1347_s15 = smov 0  }
  0x1b   :  { %s1349_s16 = smov 0   ;;  %s1351_s17 = smov 0  }
  0x1c LB: > { %1855 = sst [smem:[#allocation28_spill]] %s1247_s11  ;;  %s1388_s18 = sadd.s32 4294967295, %s1271_s17   ;;  %s1271_s17 = sphi %s1351_s17, %s36_s17   ;;  %s1267_s16 = sphi %s1349_s16, %s1907_s16   ;;  %s1263_s15 = sphi %s1347_s15, %s1906_s15   ;;  %s1259_s14 = sphi %s1345_s14, %s1898_s14   ;;  %s1255_s13 = sphi %s1343_s13, %s1905_s13   ;;  %s1251_s12 = sphi %s1341_s12, %s1904_s12   ;;  %s1247_s11 = sphi %s1339_s11, %s1896_s11   ;;  %s1243_s10 = sphi %s1337_s10, %s1903_s10   ;;  %s1239_s0 = sphi %s1335_s0, %s1902_s0   ;;  %s1235_s9 = sphi %s1333_s9, %s1901_s9   ;;  %s1231_s8 = sphi %s1331_s8, %s1900_s8   ;;  %s1227_s7 = sphi %s1329_s7, %s1899_s7  }
  0x1d   : > { %1856 = sst [smem:[#allocation29_spill]] %s1251_s12  ;;  %s48_s19 = sadd.s32 1, %s1267_s16 }
  0x1e   : > { %1857 = sst [smem:[#allocation30_spill]] %s1259_s14  ;;  %p50_p3 = scmp.ge.s32.totalorder %s48_s19, 3 }
  0x1f   : > { %p1835_p4 = scmp.eq.s32.totalorder %s1271_s17, 0  ;;  %p1834_p5 = scmp.eq.s32.totalorder %s1388_s18, 0 }
  0x20   : > { %s84_s20 = sld [smem:[#allocation5 + %s1267_s16]]  ;;  %s1909_s19 = smov (%p50_p3, %s48_s19), 0 }
  0x21   : > { %s95_s21 = sadd.s32 1, %s1247_s11  ;;  %p102_p6 = scmp.ne.s32.totalorder %s1247_s11, %s1243_s10 }
  0x22   : > { %s87_s22 = sld [smem:[#allocation5 + %s1909_s19]]  ;;  %p108_p7 = scmp.ne.s32.totalorder %s1243_s10, %s1239_s0 }
  0x23   : > { %p1403_p8 = por %p102_p6, %p1835_p4  ;;  %p1833_p10 = scmp.lt.s32.totalorder %s1271_s17, 3 }
  0x24   : > { %p1409_p9 = por %p108_p7, %p1834_p5  ;;  %s276_s25 = sand.u32 1, %s1271_s17  }
  0x25   : > { %s278_s26 = sand.u32 1, %s1247_s11   ;;  %p1434_p12 = pnand %p1833_p10, %p1403_p8 }
  0x26   : > { %s1859_s24 = scalar_select %p1409_p9, 1, 0 }
  0x27   : > { %s796_s27 = sshll.u32 %s278_s26, 5  ;;  %p801_p13 = scmp.ge.s32.totalorder %s1271_s17, 1 }
  0x28   : > { %s90_s28 = ssub.s32 %s84_s20, %s87_s22  ;;  %s280_s29 = scalar_lea.vmem [#allocation9], %s796_s27 }
  0x29   : > { %p93_p11 = scmp.eq.s32.totalorder %s90_s28, 0  ;;  %s293_s30 = sshll.u32 %s280_s29, 4  ;;  %s1428_s30 = int_to_ptr.vmem [resolvable:$true] %s293_s30 }
  0x2a   : > { %s825_s0 = scalar_select %p1403_p8, [#allocation5], [#allocation17] }
  0x2b   : > { %s1419_s6 = scalar_select %p93_p11, %s1247_s11, %s95_s21  }
  0x2c   : > { %s826_s5 = scalar_select %p1403_p8, %s1267_s16, 0 }
  0x2d   : > { %1860 = sst [smem:[#allocation31_spill]] %s1419_s6  ;;  %s1911_s0 = smov (!%p1833_p10, %s825_s0), [#allocation19] }
  0x2e   : > { %s1913_s5 = smov (!%p1833_p10, %s826_s5), 0  ;;  %p354_p0 = scmp.lt.s32.totalorder %s1271_s17, 4 }
  0x2f   : > { %s281_s22 = sld [smem:[%s1911_s0 + %s1913_s5]]  ;;  %s790_s23 = sadd.s32 4294967294, %s1271_s17  }
  0x30   : > { %p1440_p1 = pnand %p801_p13, %p354_p0  ;;  %s1863_s2 = sld [smem:[#allocation36_spill]] }
  0x31   : > { %s1450_s6 = scalar_lea.sflag [#allocation10], %s276_s25  ;;  %p977_p3 = pneg %p1434_p12 }
  0x35   : > { %s813_s26 = sshll.u32 %s281_s22, 9 }
  0x36   : > { %s1447_s29 = scalar_lea.hbm %s1863_s2, %s813_s26  ;;  %s980_s26 = scalar_lea.hbm %s1863_s2, 1536 }
  0x37   : > { %s975_s5 = scalar_lea.hbm %s1447_s29, 512  ;;  %p981_p8 = scmp.lt.u32.totalorder %s1447_s29, %s1863_s2 }
  0x38   : > { %p976_p2 = scmp.ne.s32.totalorder %s1447_s29, %s975_s5  ;;  %p982_p11 = scmp.lt.u32.totalorder %s980_s26, %s975_s5 }
  0x39   : > { %p984_p0 = scmp.lt.u32.totalorder %s975_s5, %s1447_s29 }
  0x3a   : > { %p978_p6 = pnand %p977_p3, %p976_p2  ;;  %p983_p13 = por %p982_p11, %p981_p8 }
  0x3c   : > { %p979_p7 = pneg %p978_p6  ;;  %p985_p10 = por %p984_p0, %p983_p13 }
  0x3e   : > { %p986_p5 = pnand %p985_p10, %p979_p7 }
  0x40   : > { %989 = shalt.err (!%p986_p5)
}
  0x41   : > { %s990_s25 = scalar_lea.vmem %s1428_s30, 512  ;;  %s1274_s0 = smov [#allocation9]  }
  0x42   : > { %p991_p2 = scmp.ne.s32.totalorder %s1428_s30, %s990_s25  ;;  %s995_s22 = sshll.u32 %s1274_s0, 4  ;;  %s996_s22 = int_to_ptr.vmem [resolvable:$false] %s995_s22 }
  0x43   : > { %s997_s27 = scalar_lea.vmem %s996_s22, 1024  ;;  %p998_p9 = scmp.lt.s32.totalorder %s1428_s30, %s996_s22 }
  0x44   : > { %p993_p6 = pnand %p991_p2, %p977_p3  ;;  %p999_p8 = scmp.lt.s32.totalorder %s997_s27, %s990_s25 }
  0x46   : > { %p994_p4 = pneg %p993_p6  ;;  %p1000_p11 = por %p999_p8, %p998_p9 }
  0x48   : > { %p1001_p13 = pnand %p1000_p11, %p994_p4 }
  0x4a   : > { %1004 = shalt.err (!%p1001_p13)
}
  0x4b   : > { %s1837_s5 = smov 256   ;;  %s1839_s26 = smov 16  }
  0x4c   : > { %848 = dma.hbm_to_vmem [thread:$0]  (!%p1434_p12), %s1447_s29, 512, %s1428_s30, %s1450_s6, %s1837_s5, %s1837_s5, %s1839_s26  }
  0x4d   : > { %s56_s28 = ssub.s32 %s1267_s16, %s1909_s19  ;;  %s61_s25 = sadd.s32 1, %s1259_s14 }
  0x4e   : > { %p59_p4 = scmp.eq.s32.totalorder %s56_s28, 0  ;;  %p68_p5 = scmp.ne.s32.totalorder %s1259_s14, %s1255_s13 }
  0x4f   : > { %p74_p9 = scmp.ne.s32.totalorder %s1255_s13, %s1251_s12  ;;  %p198_p10 = scmp.eq.s32.totalorder %s1388_s18, 2 }
  0x50   : > { %s1490_s0 = scalar_select %p59_p4, %s1259_s14, %s61_s25  }
  0x51   : > { %p1865_p3 = scmp.eq.s32.totalorder %s1271_s17, 0  ;;  %p1866_p0 = scmp.eq.s32.totalorder %s1388_s18, 0 }
  0x52   : > { %1864 = sst [smem:[#allocation32_spill]] %s1490_s0  ;;  %p1500_p6 = por %p198_p10, %p68_p5 }
  0x53   : > { %p70_p7 = por %p1865_p3, %p68_p5  ;;  %p1496_p2 = por %p1866_p0, %p74_p9 }
  0x54   : > { %s1868_s20 = scalar_select %p1500_p6, 1, 0 }
  0x55   : > { %s1867_s22 = scalar_select %p1496_p2, 1, 0 }
  0x56   : > { %1869 = sst [smem:[#allocation33_spill]] %s1868_s20  ;;  %p204_p12 = scmp.eq.s32.totalorder %s790_s23, 2 }
  0x57   : > { %s1507_s30 = sand.u32 1, %s1259_s14   ;;  %s812_s29 = sshll.u32 %s1267_s16, 9 }
  0x58   : > { %p1510_p8 = por %p204_p12, %p74_p9  ;;  %s793_s28 = sshll.u32 %s1507_s30, 5 }
  0x59   : > { %s1872_s1 = sld [smem:[#allocation35_spill]]  ;;  %p1873_p11 = scmp.lt.s32.totalorder %s1271_s17, 3 }
  0x5a   : > { %s1870_s27 = scalar_select %p1510_p8, 1, 0 }
  0x5b   : > { %p1522_p13 = pnand %p1873_p11, %p70_p7  ;;  %s254_s2 = scalar_lea.vmem [#allocation6], %s793_s28 }
  0x5c   : > { %1871 = sst [smem:[#allocation34_spill]] %s1870_s27  ;;  %s266_s0 = sshll.u32 %s254_s2, 4  ;;  %s1527_s0 = int_to_ptr.vmem [resolvable:$true] %s266_s0 }
  0x5d   : > { %s814_s14 = smul.u32 80, %s1507_s30  ;;  %s251_s11 = scalar_lea.sflag [#allocation7], %s1507_s30 }
  0x5e   : > { %p1007_p5 = pneg %p1522_p13 }
  0x5f   : > { %s1518_s26 = scalar_lea.hbm %s1872_s1, %s812_s29  ;;  %s1010_s27 = scalar_lea.hbm %s1872_s1, 1536 }
  0x60   : > { %s1005_s5 = scalar_lea.hbm %s1518_s26, 512  ;;  %p1011_p3 = scmp.lt.u32.totalorder %s1518_s26, %s1872_s1 }
  0x61   : > { %p1006_p4 = scmp.ne.s32.totalorder %s1518_s26, %s1005_s5  ;;  %p1012_p7 = scmp.lt.u32.totalorder %s1010_s27, %s1005_s5 }
  0x62   : > { %p1014_p12 = scmp.lt.u32.totalorder %s1005_s5, %s1518_s26 }
  0x63   : > { %p1008_p9 = pnand %p1007_p5, %p1006_p4  ;;  %p1013_p0 = por %p1012_p7, %p1011_p3 }
  0x65   : > { %p1009_p10 = pneg %p1008_p9  ;;  %p1015_p11 = por %p1014_p12, %p1013_p0 }
  0x67   : > { %p1016_p8 = pnand %p1015_p11, %p1009_p10 }
  0x69   : > { %1019 = shalt.err (!%p1016_p8)
}
  0x6a   : > { %s1020_s2 = scalar_lea.vmem %s1527_s0, 512  ;;  %s1277_s28 = smov [#allocation6]  }
  0x6b   : > { %p1021_p4 = scmp.ne.s32.totalorder %s1527_s0, %s1020_s2  ;;  %s1025_s29 = sshll.u32 %s1277_s28, 4  ;;  %s1026_s29 = int_to_ptr.vmem [resolvable:$false] %s1025_s29 }
  0x6c   : > { %s1027_s12 = scalar_lea.vmem %s1026_s29, 1024  ;;  %p1028_p2 = scmp.lt.s32.totalorder %s1527_s0, %s1026_s29 }
  0x6d   : > { %p1023_p9 = pnand %p1021_p4, %p1007_p5  ;;  %p1029_p3 = scmp.lt.s32.totalorder %s1027_s12, %s1020_s2 }
  0x6f   : > { %p1024_p6 = pneg %p1023_p9  ;;  %p1030_p7 = por %p1029_p3, %p1028_p2 }
  0x71   : > { %p1031_p0 = pnand %p1030_p7, %p1024_p6 }
  0x73   : > { %1034 = shalt.err (!%p1031_p0)
}
  0x74   : > { %s1875_s20 = smov 16   ;;  %s1876_s27 = smov 256  }
  0x75   : > { %843 = dma.hbm_to_vmem [thread:$0]  (!%p1522_p13), %s1518_s26, 512, %s1527_s0, %s251_s11, %s1876_s27, %s1876_s27, %s1875_s20  }
  0x76   : > { %s815_s5 = smul.u32 1280, %s1267_s16  ;;  %s307_s25 = scalar_lea.vmem [#allocation11], %s814_s14 }
  0x77   : > { %s319_s2 = sshll.u32 %s307_s25, 4  ;;  %s1877_s3 = sld [smem:[#allocation37_spill]]  ;;  %s1568_s2 = int_to_ptr.vmem [resolvable:$true] %s319_s2 }
  0x7d   : > { %s1566_s12 = scalar_lea.hbm %s1877_s3, %s815_s5  ;;  %s1040_s26 = scalar_lea.hbm %s1877_s3, 3840 }
  0x7e   : > { %s1035_s1 = scalar_lea.hbm %s1566_s12, 1280  ;;  %p1041_p10 = scmp.lt.u32.totalorder %s1566_s12, %s1877_s3 }
  0x7f   : > { %p1036_p2 = scmp.ne.s32.totalorder %s1566_s12, %s1035_s1  ;;  %p1042_p12 = scmp.lt.u32.totalorder %s1040_s26, %s1035_s1 }
  0x80   : > { %p1044_p4 = scmp.lt.u32.totalorder %s1035_s1, %s1566_s12 }
  0x81   : > { %p1038_p6 = pnand %p1036_p2, %p1007_p5  ;;  %p1043_p11 = por %p1042_p12, %p1041_p10 }
  0x83   : > { %p1039_p8 = pneg %p1038_p6  ;;  %p1045_p9 = por %p1044_p4, %p1043_p11 }
  0x85   : > { %p1046_p3 = pnand %p1045_p9, %p1039_p8 }
  0x87   : > { %1049 = shalt.err (!%p1046_p3)
}
  0x88   : > { %s1050_s5 = scalar_lea.vmem %s1568_s2, 1280  ;;  %s1278_s25 = smov [#allocation11]  }
  0x89   : > { %p1051_p7 = scmp.ne.s32.totalorder %s1568_s2, %s1050_s5  ;;  %s1055_s28 = sshll.u32 %s1278_s25, 4  ;;  %s1056_s28 = int_to_ptr.vmem [resolvable:$false] %s1055_s28 }
  0x8a   : > { %s1057_s29 = scalar_lea.vmem %s1056_s28, 2560  ;;  %p1058_p6 = scmp.lt.s32.totalorder %s1568_s2, %s1056_s28 }
  0x8b   : > { %p1053_p0 = pnand %p1051_p7, %p1007_p5  ;;  %p1059_p10 = scmp.lt.s32.totalorder %s1057_s29, %s1050_s5 }
  0x8d   : > { %p1054_p2 = pneg %p1053_p0  ;;  %p1060_p12 = por %p1059_p10, %p1058_p6 }
  0x8f   : > { %p1061_p11 = pnand %p1060_p12, %p1054_p2 }
  0x91   : > { %1064 = shalt.err (!%p1061_p11)
}
  0x92   : > { %851 = dma.hbm_to_vmem [thread:$0]  (!%p1522_p13), %s1566_s12, 1280, %s1568_s2, %s1450_s6, %s1876_s27, %s1876_s27, %s1875_s20  }
  0x93   : > { %s150_s1 = sld [smem:[#allocation5 + %s1267_s16]]  ;;  %p168_p5 = scmp.ne.s32.totalorder %s1235_s9, %s1231_s8 }
  0x94   : > { %s153_s23 = sld [smem:[#allocation5 + %s1909_s19]]  ;;  %p174_p8 = scmp.ne.s32.totalorder %s1231_s8, %s1227_s7 }
  0x95   : > { %p1878_p4 = scmp.eq.s32.totalorder %s1271_s17, 0  ;;  %p1879_p3 = scmp.eq.s32.totalorder %s1388_s18, 0 }
  0x96   : > { %s329_s14 = sand.u32 1, %s1235_s9   ;;  %s161_s30 = sadd.s32 1, %s1235_s9 }
  0x97   : > { %p170_p9 = por %p168_p5, %p1878_p4  ;;  %p1607_p7 = por %p174_p8, %p1879_p3 }
  0x98   : > { %s816_s5 = smul.u32 80, %s329_s14  ;;  %p1881_p13 = scmp.lt.s32.totalorder %s1271_s17, 3 }
  0x99   : > { %s1880_s11 = scalar_select %p1607_p7, 1, 0 }
  0x9a   : > { %s829_s26 = scalar_select %p170_p9, [#allocation5], [#allocation18] }
  0x9b   : > { %s156_s0 = ssub.s32 %s150_s1, %s153_s23  ;;  %p1882_p2 = pmov %p1881_p13 }
  0x9c   : > { %p159_p0 = scmp.eq.s32.totalorder %s156_s0, 0  ;;  %s1915_s26 = smov (!%p1881_p13, %s829_s26), [#allocation20] }
  0x9d   : > { %s830_s6 = scalar_select %p170_p9, %s1267_s16, 0 }
  0x9e   : > { %s1615_s2 = scalar_select %p159_p0, %s1235_s9, %s161_s30  }
  0x9f   : > { %s1917_s6 = smov (!%p1882_p2, %s830_s6), 0  ;;  %p1883_p6 = pmov %p1882_p2 }
  0xa0   : > { %s334_s12 = sld [smem:[%s1915_s26 + %s1917_s6]]  ;;  %s333_s25 = scalar_lea.vmem [#allocation12], %s816_s5 }
  0xa1   : > { %p1623_p10 = pnand %p1883_p6, %p170_p9  ;;  %s346_s28 = sshll.u32 %s333_s25, 4  ;;  %s1627_s28 = int_to_ptr.vmem [resolvable:$true] %s346_s28 }
  0xa2   : > { %s1634_s30 = scalar_lea.sflag [#allocation13], %s329_s14  ;;  %s1070_s6 = scalar_lea.hbm %s1828_s4, 3840 }
  0xa3   : > { %p1067_p11 = pneg %p1623_p10 }
  0xa6   : > { %s817_s29 = smul.u32 1280, %s334_s12 }
  0xa8   : > { %s1632_s0 = scalar_lea.hbm %s1828_s4, %s817_s29 }
  0xa9   : > { %s1065_s3 = scalar_lea.hbm %s1632_s0, 1280  ;;  %p1071_p4 = scmp.lt.u32.totalorder %s1632_s0, %s1828_s4 }
  0xaa   : > { %p1066_p12 = scmp.ne.s32.totalorder %s1632_s0, %s1065_s3  ;;  %p1072_p9 = scmp.lt.u32.totalorder %s1070_s6, %s1065_s3 }
  0xab   : > { %p1074_p0 = scmp.lt.u32.totalorder %s1065_s3, %s1632_s0 }
  0xac   : > { %p1068_p5 = pnand %p1067_p11, %p1066_p12  ;;  %p1073_p3 = por %p1072_p9, %p1071_p4 }
  0xae   : > { %p1069_p8 = pneg %p1068_p5  ;;  %p1075_p13 = por %p1074_p0, %p1073_p3 }
  0xb0   : > { %p1076_p2 = pnand %p1075_p13, %p1069_p8 }
  0xb2   : > { %1079 = shalt.err (!%p1076_p2)
}
  0xb3   : > { %s1080_s14 = scalar_lea.vmem %s1627_s28, 1280  ;;  %s1279_s29 = smov [#allocation12]  }
  0xb4   : > { %p1081_p6 = scmp.ne.s32.totalorder %s1627_s28, %s1080_s14  ;;  %s1085_s1 = sshll.u32 %s1279_s29, 4  ;;  %s1086_s1 = int_to_ptr.vmem [resolvable:$false] %s1085_s1 }
  0xb5   : > { %s1087_s23 = scalar_lea.vmem %s1086_s1, 2560  ;;  %p1088_p7 = scmp.lt.s32.totalorder %s1627_s28, %s1086_s1 }
  0xb6   : > { %p1083_p12 = pnand %p1081_p6, %p1067_p11  ;;  %p1089_p4 = scmp.lt.s32.totalorder %s1087_s23, %s1080_s14 }
  0xb8   : > { %p1084_p5 = pneg %p1083_p12  ;;  %p1090_p9 = por %p1089_p4, %p1088_p7 }
  0xba   : > { %p1091_p3 = pnand %p1090_p9, %p1084_p5 }
  0xbc   : > { %1094 = shalt.err (!%p1091_p3)
}
  0xbd   : > { %856 = dma.hbm_to_vmem [thread:$0]  (!%p1623_p10), %s1632_s0, 1280, %s1627_s28, %s1634_s30, %s1876_s27, %s1876_s27, %s1875_s20  }
  0xbe   : > { %358 = sbr.rel (%p1440_p1) target bundleno = 467 (0x1d3), region = 36  ;;  %s1668_s3 = sand.u32 (!%p1440_p1), 1, %s1255_s13  }
  0xbf   : > { %s802_s26 = sshll.u32 (!%p1440_p1), %s1668_s3, 5  ;;  %s361_s5 = scalar_lea.sflag (!%p1440_p1), [#allocation7], %s1668_s3 }
  0xc0   : > { %s364_s6 = scalar_lea.vmem (!%p1440_p1), [#allocation6], %s802_s26  ;;  %p1885_p7 = scmp.ne.s32.totalorder (!%p1440_p1), %s1867_s22, 0 }
  0xc5   : > { %1202 = dma.done.wait (%p1885_p7), %s361_s5, 512  }
  0xc6   : > { %1204 = vsyncadd (%p1885_p7), %s361_s5, 4294966784  ;;  %s369_s20 = sand.u32 1, %s1388_s18   ;;  %s371_s21 = sand.u32 1, %s1243_s10  }
  0xc7   : > { %s803_s27 = sshll.u32 %s371_s21, 5  ;;  %s370_s7 = scalar_lea.sflag [#allocation10], %s369_s20 }
  0xc8   : > { %s373_s28 = scalar_lea.vmem [#allocation9], %s803_s27  ;;  %p1886_p1 = scmp.ne.s32.totalorder %s1859_s24, 0 }
  0xca   : > { %1206 = dma.done.wait (%p1886_p1), %s370_s7, 512  }
  0xcb   : > { %1208 = vsyncadd (%p1886_p1), %s370_s7, 4294966784  ;;  %s818_s0 = smul.u32 80, %s1668_s3 }
  0xcd   : > { %s1683_s30 = scalar_lea.vmem [#allocation11], %s818_s0 }
  0xce   : > { %1210 = dma.done.wait (%p1885_p7), %s370_s7, 1280  }
  0xcf   : > { %1212 = vsyncadd (%p1885_p7), %s370_s7, 4294966016  ;;  %s387_s18 = sand.u32 1, %s1231_s8   ;;  %p1887_p10 = scmp.ne.s32.totalorder %s1880_s11, 0 }
  0xd0   : > { %s819_s12 = smul.u32 80, %s387_s18  ;;  %s388_s25 = scalar_lea.sflag [#allocation13], %s387_s18 }
  0xd2   : > { %s1690_s14 = scalar_lea.vmem [#allocation12], %s819_s12 }
  0xd3   : > { %1214 = dma.done.wait (%p1887_p10), %s388_s25, 1280  }
  0xd4   : > { %1216 = vsyncadd (%p1887_p10), %s388_s25, 4294966016  ;;  %v460_v0 = vld [vmem:[%s364_s6] sm:$0xff]  ;;  %v461_v1 = vld [vmem:[%s364_s6 + $0x8] sm:$0xff]  ;;  %s1888_s24 = sld [smem:[#allocation33_spill]]  ;;  %s804_s22 = sshll.u32 %s1668_s3, 3 }
  0xd5   : > { %v462_v2 = vld [vmem:[%s364_s6 + $0x10] sm:$0xff]  ;;  %v463_v3 = vld [vmem:[%s364_s6 + $0x18] sm:$0xff]  ;;  %v464_v4 = vld [vmem:[%s373_s28] sm:$0xff]  ;;  %s808_s11 = sshll.u32 %s1263_s15, 7  ;;  %s430_s29 = scalar_lea.vmem [#allocation14], %s804_s22 }
  0xd6   : > { %v465_v5 = vld [vmem:[%s373_s28 + $0x8] sm:$0xff]  ;;  %v466_v6 = vld [vmem:[%s373_s28 + $0x10] sm:$0xff]  ;;  %v467_v7 = vld [vmem:[%s373_s28 + $0x18] sm:$0xff]  ;;  %v468_v8 = vsub.f32 %v460_v0, %v464_v4  ;;  %s588_s1 = sshll.u32 %s430_s29, 4  ;;  %s1889_s5 = sld [smem:[#allocation38_spill]]  ;;  %s1727_s1 = int_to_ptr.vmem [resolvable:$true] %s588_s1 }
  0xd7   : > { %v469_v9 = vsub.f32 %v461_v1, %v465_v5  ;;  %v470_v10 = vsub.f32 %v462_v2, %v466_v6  ;;  %v471_v11 = vsub.f32 %v463_v3, %v467_v7  ;;  %v484_v12 = vld [vmem:[%s1683_s30] sm:$0xff]  ;;  %v485_v13 = vld [vmem:[%s1683_s30 + $0x8] sm:$0xff]  ;;  %v486_v14 = vld [vmem:[%s1683_s30 + $0x10] sm:$0xff]  ;;  %s570_s21 = scalar_lea.sflag [#allocation8], %s1668_s3  ;;  %s1095_s27 = scalar_lea.vmem %s1727_s1, 128 }
  0xd8   : > { %v474_v15 = vmul.f32 %v468_v8, %v468_v8  ;;  %v487_v17 = vld [vmem:[%s1683_s30 + $0x18] sm:$0xff]  ;;  %v488_v18 = vld [vmem:[%s1683_s30 + $0x20] sm:$0xff]  ;;  %v489_v19 = vld [vmem:[%s1683_s30 + $0x28] sm:$0xff]  ;;  %p1096_p11 = scmp.ne.s32.totalorder %s1727_s1, %s1095_s27  ;;  %s1280_s7 = smov [#allocation14]  }
  0xd9   : > { %v475_v16 = vmul.f32 %v469_v9, %v469_v9  ;;  %v476_v20 = vmul.f32 %v470_v10, %v470_v10  ;;  %v477_v21 = vmul.f32 %v471_v11, %v471_v11  ;;  %v490_v22 = vld [vmem:[%s1683_s30 + $0x30] sm:$0xff]  ;;  %v491_v23 = vld [vmem:[%s1683_s30 + $0x38] sm:$0xff]  ;;  %v492_v24 = vld [vmem:[%s1683_s30 + $0x40] sm:$0xff]  ;;  %s1099_s28 = sshll.u32 %s1280_s7, 4  ;;  %s1100_s28 = int_to_ptr.vmem [resolvable:$false] %s1099_s28 }
  0xda   : > { %v493_v25 = vld [vmem:[%s1683_s30 + $0x48] sm:$0xff]  ;;  %v494_v26 = vld [vmem:[%s1690_s14] sm:$0xff]  ;;  %v496_v28 = vld [vmem:[%s1690_s14 + $0x10] sm:$0xff]  ;;  %p1890_p8 = scmp.ne.s32.totalorder %s1888_s24, 0  ;;  %s1101_s0 = scalar_lea.vmem %s1100_s28, 256 }
  0xdb   : > { %v495_v27 = vld [vmem:[%s1690_s14 + $0x8] sm:$0xff]  ;;  %v478_v29 = vadd.f32 %v476_v20, %v474_v15  ;;  %v479_v30 = vadd.f32 %v477_v21, %v475_v16  ;;  %v497_v31 = vld [vmem:[%s1690_s14 + $0x18] sm:$0xff]  ;;  %v498_v32 = vld [vmem:[%s1690_s14 + $0x20] sm:$0xff]  ;;  %v504_v34 = vsub.f32 %v484_v12, %v494_v26  ;;  %v506_v39 = vsub.f32 %v486_v14, %v496_v28  ;;  %p1102_p2 = scmp.lt.s32.totalorder %s1727_s1, %s1100_s28  ;;  %p1103_p6 = scmp.lt.s32.totalorder %s1101_s0, %s1095_s27 }
  0xdc   : > { %v499_v33 = vld [vmem:[%s1690_s14 + $0x28] sm:$0xff]  ;;  %v505_v35 = vsub.f32 %v485_v13, %v495_v27  ;;  %v500_v36 = vld [vmem:[%s1690_s14 + $0x30] sm:$0xff]  ;;  %v501_v37 = vld [vmem:[%s1690_s14 + $0x38] sm:$0xff]  ;;  %v507_v40 = vsub.f32 %v487_v17, %v497_v31  ;;  %v508_v41 = vsub.f32 %v488_v18, %v498_v32  ;;  %s1725_s6 = scalar_lea.hbm %s1889_s5, %s808_s11  ;;  %p1097_p0 = pnand %p1096_p11, %p1890_p8 }
  0xdd   : > { %v502_v38 = vld [vmem:[%s1690_s14 + $0x40] sm:$0xff]  ;;  %v509_v42 = vsub.f32 %v489_v19, %v499_v33  ;;  %v543_v43 = vadd.f32 %v479_v30, %v478_v29  ;;  %v503_v44 = vld [vmem:[%s1690_s14 + $0x48] sm:$0xff]  ;;  %v510_v45 = vsub.f32 %v490_v22, %v500_v36  ;;  %v511_v46 = vsub.f32 %v491_v23, %v501_v37  ;;  %p1104_p12 = por %p1103_p6, %p1102_p2 }
  0xde   : > { %v512_v47 = vsub.f32 %v492_v24, %v502_v38  ;;  %v516_v48 = vmul.f32 %v504_v34, %v504_v34  ;;  %v517_v49 = vmul.f32 %v505_v35, %v505_v35  ;;  %v518_v50 = vmul.f32 %v506_v39, %v506_v39  ;;  %p1098_p13 = pneg %p1097_p0 }
  0xdf   : > { %544 = vadd.xlane.f32.xlu0 %v543_v43  ;;  %v513_v51 = vsub.f32 %v493_v25, %v503_v44  ;;  %v519_v52 = vmul.f32 %v507_v40, %v507_v40  ;;  %v520_v53 = vmul.f32 %v508_v41, %v508_v41  ;;  %v521_v54 = vmul.f32 %v509_v42, %v509_v42 }
  0xe0   : > { %v522_v55 = vmul.f32 %v510_v45, %v510_v45  ;;  %v526_v56 = vadd.f32 %v518_v50, %v516_v48  ;;  %v523_v57 = vmul.f32 %v511_v46, %v511_v46  ;;  %v524_v59 = vmul.f32 %v512_v47, %v512_v47  ;;  %p1105_p5 = pnand %p1104_p12, %p1098_p13 }
  0xe1   : > { %v530_v58 = vadd.f32 %v519_v52, %v517_v49  ;;  %v525_v61 = vmul.f32 %v513_v51, %v513_v51 }
  0xe2   : > { %v527_v60 = vadd.f32 %v526_v56, %v520_v53 }
  0xe3   : > { %v531_v62 = vadd.f32 %v530_v58, %v521_v54 }
  0xe4   : > { %v528_v63 = vadd.f32 %v527_v60, %v522_v55 }
  0xe5   : > { %v532_v0 = vadd.f32 %v531_v62, %v523_v57 }
  0xe6   : > { %v529_v1 = vadd.f32 %v528_v63, %v524_v59 }
  0xe7   : > { %v533_v2 = vadd.f32 %v532_v0, %v525_v61 }
  0xe9   : > { %v557_v3 = vadd.f32 %v533_v2, %v529_v1 }
  0xeb   : > { %558 = vadd.xlane.f32.xlu0 %v557_v3 }
 0x16c   : > { %v545_v4 = vpop.xlane.xlu0 %544 }
 0x16d   : > { %v546_v5 = vrot.slane %v545_v4, 4 }
 0x16f   : > { %v547_v6 = vadd.f32 %v546_v5, %v545_v4 }
 0x171   : > { %v548_v7 = vrot.slane %v547_v6, 2 }
 0x173   : > { %v549_v8 = vadd.f32 %v548_v7, %v547_v6 }
 0x175   : > { %v550_v9 = vrot.slane %v549_v8, 1 }
 0x177   : > { %v551_v10 = vadd.f32 %v550_v9, %v549_v8 }
 0x178   : > { %v559_v11 = vpop.xlane.xlu0 %558 }
 0x179   : > { %v560_v12 = vrot.slane %v559_v11, 4  ;;  %820 = vpush %v551_v10 }
 0x17b   : > { %v561_v13 = vadd.f32 %v560_v12, %v559_v11 }
 0x17d   : > { %v562_v14 = vrot.slane %v561_v13, 2 }
 0x17f   : > { %v563_v15 = vadd.f32 %v562_v14, %v561_v13 }
 0x181   : > { %v564_v16 = vrot.slane %v563_v15, 1 }
 0x183   : > { %v565_v17 = vadd.f32 %v564_v16, %v563_v15 }
 0x185   : > { %822 = vpush %v565_v17 }
 0x1aa   : > { %s821_s20 = spop %820 }
 0x1ab   : > { %v553_v18 = vstv %s821_s20 }
 0x1ac   : > { %554 = vst [vmem:[%s430_s29] sm:$0xff] %v553_v18 }
 0x1ad   : > { %1108 = shalt.err (!%p1105_p5)
}
 0x1ae   : > { %s1109_s30 = scalar_lea.hbm %s1725_s6, 128  ;;  %s1113_s25 = scalar_lea.hbm %s1889_s5, 384 }
 0x1af   : > { %p1110_p4 = scmp.ne.s32.totalorder %s1725_s6, %s1109_s30  ;;  %p1114_p7 = scmp.lt.u32.totalorder %s1725_s6, %s1889_s5 }
 0x1b0   : > { %p1115_p1 = scmp.lt.u32.totalorder %s1113_s25, %s1109_s30  ;;  %p1117_p11 = scmp.lt.u32.totalorder %s1109_s30, %s1725_s6 }
 0x1b1   : > { %p1111_p9 = pnand %p1110_p4, %p1890_p8 }
 0x1b2   : > { %p1116_p10 = por %p1115_p1, %p1114_p7 }
 0x1b3   : > { %p1112_p3 = pneg %p1111_p9 }
 0x1b4   : > { %p1118_p0 = por %p1117_p11, %p1116_p10 }
 0x1b6   : > { %p1119_p13 = pnand %p1118_p0, %p1112_p3 }
 0x1b8   : > { %1122 = shalt.err (!%p1119_p13)
}
 0x1b9   : > { %836 = dma.vmem_to_hbm [thread:$0]  (%p1890_p8), %s1727_s1, 128, %s1725_s6, %s570_s21  }
 0x1ba   : > { %s437_s23 = scalar_lea.vmem [#allocation15], %s804_s22  ;;  %s823_s20 = spop %822 }
 0x1bb   : > { %s601_s26 = sshll.u32 %s437_s23, 4  ;;  %s1891_s28 = sld [smem:[#allocation39_spill]]  ;;  %v567_v19 = vstv %s823_s20  ;;  %s1753_s26 = int_to_ptr.vmem [resolvable:$true] %s601_s26 }
 0x1bc   : > { %568 = vst [vmem:[%s437_s23] sm:$0xff] %v567_v19  ;;  %s575_s30 = scalar_lea.sflag [#allocation16], %s1668_s3  ;;  %s1123_s18 = scalar_lea.vmem %s1753_s26, 128 }
 0x1bd   : > { %p1124_p2 = scmp.ne.s32.totalorder %s1753_s26, %s1123_s18  ;;  %s1281_s22 = smov [#allocation15]  }
 0x1be   : > { %s1127_s1 = sshll.u32 %s1281_s22, 4  ;;  %s1128_s1 = int_to_ptr.vmem [resolvable:$false] %s1127_s1 }
 0x1bf   : > { %p1125_p6 = pnand %p1124_p2, %p1890_p8  ;;  %s1129_s6 = scalar_lea.vmem %s1128_s1, 256 }
 0x1c0   : > { %p1130_p5 = scmp.lt.s32.totalorder %s1753_s26, %s1128_s1  ;;  %p1131_p4 = scmp.lt.s32.totalorder %s1129_s6, %s1123_s18 }
 0x1c1   : > { %s1760_s0 = scalar_lea.hbm %s1891_s28, %s808_s11  ;;  %p1126_p12 = pneg %p1125_p6 }
 0x1c2   : > { %p1132_p9 = por %p1131_p4, %p1130_p5 }
 0x1c4   : > { %p1133_p3 = pnand %p1132_p9, %p1126_p12 }
 0x1c6   : > { %1136 = shalt.err (!%p1133_p3)
}
 0x1c7   : > { %s1137_s15 = scalar_lea.hbm %s1760_s0, 128  ;;  %s1141_s21 = scalar_lea.hbm %s1891_s28, 384 }
 0x1c8   : > { %p1138_p7 = scmp.ne.s32.totalorder %s1760_s0, %s1137_s15  ;;  %p1142_p11 = scmp.lt.u32.totalorder %s1760_s0, %s1891_s28 }
 0x1c9   : > { %p1143_p0 = scmp.lt.u32.totalorder %s1141_s21, %s1137_s15  ;;  %p1145_p2 = scmp.lt.u32.totalorder %s1137_s15, %s1760_s0 }
 0x1ca   : > { %p1139_p1 = pnand %p1138_p7, %p1890_p8 }
 0x1cb   : > { %p1144_p13 = por %p1143_p0, %p1142_p11 }
 0x1cc   : > { %p1140_p10 = pneg %p1139_p1 }
 0x1cd   : > { %p1146_p6 = por %p1145_p2, %p1144_p13 }
 0x1cf   : > { %p1147_p12 = pnand %p1146_p6, %p1140_p10 }
 0x1d1   : > { %1150 = shalt.err (!%p1147_p12)
}
 0x1d2   : > { %837 = dma.vmem_to_hbm [thread:$0]  (%p1890_p8), %s1753_s26, 128, %s1760_s0, %s575_s30  }
 0x1d3 PF: > { %s1892_s14 = sld [smem:[#allocation29_spill]]  ;;  %s1893_s29 = sld [smem:[#allocation34_spill]] }
 0x1d4   : > { %p865_p5 = scmp.ge.s32.totalorder %s1271_s17, 2 }
 0x1d9   : > { %s613_s23 = sand.u32 1, %s1892_s14   ;;  %p1894_p4 = scmp.ne.s32.totalorder %s1893_s29, 0 }
 0x1da   : > { %s614_s20 = scalar_lea.sflag [#allocation8], %s613_s23 }
 0x1db   : > { %p858_p9 = pnand %p865_p5, %p1894_p4 }
 0x1dd   : > { %1218 = dma.done.wait (!%p858_p9), %s614_s20, 128  }
 0x1de   : > { %1220 = vsyncadd (!%p858_p9), %s614_s20, 4294967168  ;;  %s623_s27 = scalar_lea.sflag [#allocation16], %s613_s23 }
 0x1df   : > { %1222 = dma.done.wait (!%p858_p9), %s623_s27, 128  }
 0x1e0   : > { %1224 = vsyncadd (!%p858_p9), %s623_s27, 4294967168  ;;  %s36_s17 = sadd.s32 1, %s1271_s17   ;;  %s1895_s24 = sld [smem:[#allocation28_spill]] }
 0x1e1   : > { %p33_p3 = scmp.ge.s32.totalorder %s36_s17, 5   ;;  %s1896_s11 = sld [smem:[#allocation31_spill]] }
 0x1e2   : > { %s1897_s26 = sld [smem:[#allocation30_spill]]  ;;  %s1898_s14 = sld [smem:[#allocation32_spill]] }
 0x1e3   : > { %s1899_s7 = smov %s1231_s8  ;;  %s1900_s8 = smov %s1235_s9 }
 0x1e4   : > { %s1901_s9 = smov %s1615_s2  ;;  %s1902_s0 = smov %s1243_s10 }
 0x1e5   : > { %s1904_s12 = smov %s1255_s13  ;;  %s1906_s15 = smov %s1267_s16 }
 0x1e6   : > { %s1903_s10 = smov %s1895_s24  ;;  %s1907_s16 = smov %s1909_s19 }
 0x1e7   :  { %35 = sbr.rel (!%p33_p3) target bundleno = 28 (0x1c), region = 143 }
 0x1e8   : > { %s1905_s13 = smov %s1897_s26 }
 0x1ee   :  { %628 = vsyncpa [#allocation7], 1 }
 0x1ef   :  { %630 = vsyncpa [#allocation7 + $0x1], 1 }
 0x1f0   :  { %631 = vsyncpa [#allocation10], 1 }
 0x1f1   :  { %633 = vsyncpa [#allocation10 + $0x1], 1 }
 0x1f2   :  { %634 = vsyncpa [#allocation13], 1 }
 0x1f3   :  { %636 = vsyncpa [#allocation13 + $0x1], 1 }
 0x1f4   :  { %637 = vsyncpa [#allocation8], 1 }
 0x1f5   :  { %639 = vsyncpa [#allocation8 + $0x1], 1 }
 0x1f6   :  { %640 = vsyncpa [#allocation16], 1 }
 0x1f7   :  { %642 = vsyncpa [#allocation16 + $0x1], 1 }

</bundles_post_ra>
